<compile_context>
chip_gen: v7x
topology: tpu7x:2x2x1
jax: 0.10.0
libtpu: 0.0.40
codegen_flags: <defaults>
</compile_context>

<pallas_src>
import jax
import jax.numpy as jnp
from jax.experimental import pallas as pl
from jax.experimental.pallas import tpu as pltpu

NUM_STATES = 2      # MountainCar-v0 observation dim
NUM_ACTIONS = 3     # MountainCar-v0 action dim
HIDDEN = 30

LANES = 128                      # lane width HIDDEN is padded to
K_IN = 8                         # x packed to 8 cols: [states | 1 | zeros]
_W1B1_ROWS = K_IN                # slab rows 0..7  : w1 (rows 0..1), b1 (row 2)
_W2_ROW0 = _W1B1_ROWS            # slab rows 8..135: w2 (rows 0..29), b2 (row 30)
_SLAB_ROWS = _W2_ROW0 + LANES    # 136 rows total (multiple of 8)


def _round_up(x, m):
    return (x + m - 1) // m * m


def pack_params(w1, b1, w2, b2):
    """Pack all parameters into one (136, 128) f32 slab (zero-padded).

    Layout:
      rows [0, NUM_STATES)        : w1 (NUM_STATES, HIDDEN) in lanes [0, HIDDEN)
      row  NUM_STATES             : b1 in lanes [0, HIDDEN), and a 1.0 at lane
                                    HIDDEN (bias passthrough for fc2)
      rows [8, 8 + HIDDEN)        : w2 (HIDDEN, NUM_ACTIONS) in lanes [0, 3)
      row  8 + HIDDEN             : b2 (NUM_ACTIONS,)        in lanes [0, 3)
    """
    slab = jnp.zeros((_SLAB_ROWS, LANES), jnp.float32)
    slab = slab.at[0:NUM_STATES, 0:HIDDEN].set(w1.astype(jnp.float32))
    slab = slab.at[NUM_STATES, 0:HIDDEN].set(b1.reshape(-1).astype(jnp.float32))
    slab = slab.at[NUM_STATES, HIDDEN].set(1.0)        # bias-passthrough lane
    slab = slab.at[_W2_ROW0:_W2_ROW0 + HIDDEN, 0:NUM_ACTIONS].set(
        w2.astype(jnp.float32))
    slab = slab.at[_W2_ROW0 + HIDDEN, 0:NUM_ACTIONS].set(
        b2.reshape(-1).astype(jnp.float32))
    return slab


def _net_kernel(x_ref, p_ref, out_ref):
    x8 = x_ref[...]                                  # (BM, 8): [states | 1 | 0]
    w1b1 = p_ref[0:_W1B1_ROWS, :]                    # (8, 128)   aligned slice
    w2b2 = p_ref[_W2_ROW0:_W2_ROW0 + LANES, :]       # (128, 128) aligned slice

    # fc1 (+ b1 via the "1" column of x8); ReLU keeps the passthrough lane = 1.
    h = jnp.maximum(jnp.dot(x8, w1b1, preferred_element_type=jnp.float32), 0.0)
    # fc2 (+ b2 via row HIDDEN of the weight block paired with lane HIDDEN of h).
    y = jnp.dot(h, w2b2, preferred_element_type=jnp.float32)

    out_ref[...] = y[:, :NUM_ACTIONS]                # only 3 useful lanes hit HBM


def _choose_bm(b8, block_b):
    bm = min(block_b, b8)
    # v7x has 2 TensorCores: for large batches make sure the "parallel" grid
    # has at least two programs so both cores get work (no-op on v5e/v6e).
    if b8 >= 256:
        bm = min(bm, max(128, _round_up((b8 + 1) // 2, 8)))
    return bm


def net_forward(x, params_slab, *, block_b=1024):
    """x: (B, NUM_STATES); params_slab from pack_params().
    Returns (B, NUM_ACTIONS) f32."""
    B = x.shape[0]
    b8 = _round_up(B, 8)
    BM = _choose_bm(b8, block_b)
    B_pad = _round_up(b8, BM)

    # Pack x as (B_pad, 8): [state_0, state_1, 1, 0, ...]. The "1" column feeds
    # b1 through the fc1 matmul; padded rows stay all-zero (and are dropped).
    x8 = jnp.concatenate(
        [x.astype(jnp.float32),
         jnp.ones((B, 1), jnp.float32),
         jnp.zeros((B, K_IN - NUM_STATES - 1), jnp.float32)], axis=1)
    if B_pad != B:
        x8 = jnp.pad(x8, ((0, B_pad - B), (0, 0)))

    out = pl.pallas_call(
        _net_kernel,
        out_shape=jax.ShapeDtypeStruct((B_pad, NUM_ACTIONS), jnp.float32),
        grid=(B_pad // BM,),
        in_specs=[
            pl.BlockSpec((BM, K_IN), lambda i: (i, 0)),
            # constant block index -> single DMA, params stay VMEM-resident
            pl.BlockSpec((_SLAB_ROWS, LANES), lambda i: (0, 0)),
        ],
        out_specs=pl.BlockSpec((BM, NUM_ACTIONS), lambda i: (i, 0)),
        compiler_params=pltpu.CompilerParams(
            dimension_semantics=("parallel",),
        ),
    )(x8, params_slab)
    return out if B_pad == B else out[:B]


def init_params(key):
    """Mirrors the PyTorch module: weights ~ Normal(0, 0.1); biases use the
    PyTorch Linear default Uniform(-1/sqrt(fan_in), 1/sqrt(fan_in))."""
    k1, k2, k3, k4 = jax.random.split(key, 4)
    w1 = 0.1 * jax.random.normal(k1, (NUM_STATES, HIDDEN), dtype=jnp.float32)
    bound1 = 1.0 / jnp.sqrt(jnp.float32(NUM_STATES))
    b1 = jax.random.uniform(k2, (HIDDEN,), minval=-bound1, maxval=bound1,
                            dtype=jnp.float32)
    w2 = 0.1 * jax.random.normal(k3, (HIDDEN, NUM_ACTIONS), dtype=jnp.float32)
    bound2 = 1.0 / jnp.sqrt(jnp.float32(HIDDEN))
    b2 = jax.random.uniform(k4, (NUM_ACTIONS,), minval=-bound2, maxval=bound2,
                            dtype=jnp.float32)
    return w1, b1, w2, b2


if __name__ == "__main__":
    key = jax.random.PRNGKey(0)
    kx, kp = jax.random.split(key)

    w1, b1, w2, b2 = init_params(kp)
    slab = pack_params(w1, b1, w2, b2)          # packed once, reused every call

    # DQN-style replay batch; B=256 also exercises the 2-program grid path.
    B = 256
    x = jax.random.normal(kx, (B, NUM_STATES), dtype=jnp.float32)
    out = net_forward(x, slab)
    jax.block_until_ready(out)

    ref = jnp.maximum(x @ w1 + b1, 0.0) @ w2 + b2
    assert out.shape == (B, NUM_ACTIONS)
    assert jnp.allclose(out, ref, atol=1e-5, rtol=1e-4)

    # ragged small batch (B not a multiple of 8) exercises the padding path
    x_small = jax.random.normal(jax.random.PRNGKey(1), (5, NUM_STATES),
                                dtype=jnp.float32)
    out_small = net_forward(x_small, slab)
    jax.block_until_ready(out_small)
    ref_small = jnp.maximum(x_small @ w1 + b1, 0.0) @ w2 + b2
    assert out_small.shape == (5, NUM_ACTIONS)
    assert jnp.allclose(out_small, ref_small, atol=1e-5, rtol=1e-4)

    print("KERNEL_OK")
</pallas_src>

<mosaic_0001>
module attributes {stable_mosaic.version = 11 : i64} {
  func.func @_net_kernel(%arg0: i32, %arg1: memref<128x8xf32, #tpu.memory_space<vmem>>, %arg2: memref<136x128xf32, #tpu.memory_space<vmem>>, %arg3: memref<128x3xf32, #tpu.memory_space<vmem>>) attributes {dimension_semantics = [#tpu.dimension_semantics<parallel>], iteration_bounds = array<i64: 2>, scalar_prefetch = 0 : i64, scratch_operands = 0 : i64, tpu.core_type = #tpu.core_type<tc>, window_params = [{transform_indices = @transform_0, window_bounds = array<i64: 128, 8>}, {pipeline_mode = #tpu.pipeline_mode<synchronous>, transform_indices = @transform_1, window_bounds = array<i64: 136, 128>}, {transform_indices = @transform_2, window_bounds = array<i64: 128, 3>}]} {
    %c0 = arith.constant 0 : index
    %c0_0 = arith.constant 0 : index
    %0 = vector.load %arg1[%c0, %c0_0] : memref<128x8xf32, #tpu.memory_space<vmem>>, vector<128x8xf32>
    %c0_1 = arith.constant 0 : index
    %c0_2 = arith.constant 0 : index
    %1 = vector.load %arg2[%c0_1, %c0_2] : memref<136x128xf32, #tpu.memory_space<vmem>>, vector<8x128xf32>
    %c8 = arith.constant 8 : index
    %c0_3 = arith.constant 0 : index
    %2 = vector.load %arg2[%c8, %c0_3] : memref<136x128xf32, #tpu.memory_space<vmem>>, vector<128x128xf32>
    %cst = arith.constant dense<0.000000e+00> : vector<128x128xf32>
    %3 = tpu.matmul %0, %1, %cst {dimension_numbers = #tpu.dot_dimension_numbers<[1], [0], [0], [1], [0, 0, 1, 1], [], []>} : vector<128x8xf32>, vector<8x128xf32>, vector<128x128xf32> -> vector<128x128xf32>
    %cst_4 = arith.constant 0.000000e+00 : f32
    %4 = vector.broadcast %cst_4 : f32 to vector<128x128xf32>
    %5 = arith.maximumf %3, %4 : vector<128x128xf32>
    %cst_5 = arith.constant dense<0.000000e+00> : vector<128x128xf32>
    %6 = tpu.matmul %5, %2, %cst_5 {dimension_numbers = #tpu.dot_dimension_numbers<[1], [0], [0], [1], [0, 0, 1, 1], [], []>} : vector<128x128xf32>, vector<128x128xf32>, vector<128x128xf32> -> vector<128x128xf32>
    %7 = vector.extract_strided_slice %6 {offsets = [0, 0], sizes = [128, 3], strides = [1, 1]} : vector<128x128xf32> to vector<128x3xf32>
    %c0_6 = arith.constant 0 : index
    %c0_7 = arith.constant 0 : index
    %8 = vector.load %arg3[%c0_6, %c0_7] : memref<128x3xf32, #tpu.memory_space<vmem>>, vector<128x3xf32>
    tpu.vector_store %arg3[%c0_6, %c0_7], %7 {strides = array<i32>} : memref<128x3xf32, #tpu.memory_space<vmem>>, vector<128x3xf32>,
    return
  }
  func.func @transform_0(%arg0: i32) -> (i32, i32) {
    %c0_i32 = arith.constant 0 : i32
    %c0_i32_0 = arith.constant 0 : i32
    return %arg0, %c0_i32 : i32, i32
  }
  func.func @transform_1(%arg0: i32) -> (i32, i32) {
    %c0_i32 = arith.constant 0 : i32
    %c0_i32_0 = arith.constant 0 : i32
    %c0_i32_1 = arith.constant 0 : i32
    return %c0_i32, %c0_i32_0 : i32, i32
  }
  func.func @transform_2(%arg0: i32) -> (i32, i32) {
    %c0_i32 = arith.constant 0 : i32
    %c0_i32_0 = arith.constant 0 : i32
    return %arg0, %c0_i32 : i32, i32
  }
}

</mosaic_0001>

<bundles_post_ra>
// kernel: tpu_custom_call.1
= control target key start
LH: loop header
LB: loop body
LE: loop exit
PB: predicated region body
PF: predicated region fallthrough
CT: control target
= control target key end

     0   :  { %s845_s9 = smov 0   ;;  %s988_s0 = inlined_call_operand.vmem [shape: f32[256,8], index: 0, kind: input, shape index: {}]   ;;  %s989_s1 = inlined_call_operand.vmem [shape: f32[136,128], index: 1, kind: input, shape index: {}]   ;;  %s990_s2 = inlined_call_operand.vmem [shape: f32[256,3], index: 2, kind: output, shape index: {}]  }
   0x1 LB: > { %s608_s10 = sadd.s32 4294967295, %s828_s9   ;;  %p612_p0 = scmp.ge.s32.totalorder %s828_s9, 1  ;;  %s828_s9 = sphi %s845_s9, %s12_s9  }
   0x2   : > { %p113_p1 = scmp.lt.s32.totalorder %s828_s9, 3 }
   0x4   : > { %p114_p2 = pnand %p612_p0, %p113_p1 }
   0x5   : > { %v163_v0 = vld [vmem:[%s989_s1] sm:$0xff] (!%p114_p2)  ;;  %s613_s13 = sshll.u32 (!%p114_p2), %s608_s10, 4  ;;  %v164_v1 = vld [vmem:[%s989_s1 + $0x8] sm:$0xff] (!%p114_p2)  ;;  %v165_v2 = vld [vmem:[%s989_s1 + $0x10] sm:$0xff] (!%p114_p2)  ;;  %vm180_vm0 = vcmask (!%p114_p2), 64512   ;;  %vm535_vm1 = vcmask (!%p114_p2), 23552  }
   0x6   : > { %117 = sbr.rel (%p114_p2) target bundleno = 476 (0x1dc), region = 28  ;;  %684 = vmatprep.subr.mxu0 (!%p114_p2), %v163_v0  ;;  %p136_p3 = scmp.lt.s32.totalorder (!%p114_p2), %s613_s13, 31  ;;  %v766_v3 = vpack.c.bf16 (!%p114_p2), %v165_v2, %v164_v1  ;;  %v166_v4 = vld [vmem:[%s989_s1 + $0x18] sm:$0xff] (!%p114_p2)  ;;  %v167_v5 = vld [vmem:[%s989_s1 + $0x20] sm:$0xff] (!%p114_p2)  ;;  %v168_v7 = vld [vmem:[%s989_s1 + $0x28] sm:$0xff] (!%p114_p2) }
   0x7   : > { %685 = vmatpush3.msra.mxu0 (!%p114_p2), %v163_v0  ;;  %v770_v6 = vpack.c.bf16 (!%p114_p2), %v167_v5, %v166_v4  ;;  %v169_v8 = vld [vmem:[%s989_s1 + $0x30] sm:$0xff] (!%p114_p2)  ;;  %v170_v13 = vld [vmem:[%s989_s1 + $0x38] sm:$0xff] (!%p114_p2)  ;;  %v171_v14 = vld [vmem:[%s989_s1 + $0x40] sm:$0xff] (!%p114_p2) }
   0x8   : > { %767 = vmatprep.subr.bf16.mxu0 (!%p114_p2), %v766_v3  ;;  %798 = vmatprep.subr.bf16.mxu1 (!%p114_p2), %v766_v3  ;;  %v774_v12 = vpack.c.bf16 (!%p114_p2), %v169_v8, %v168_v7  ;;  %v778_v17 = vpack.c.bf16 (!%p114_p2), %v171_v14, %v170_v13  ;;  %v172_v18 = vld [vmem:[%s989_s1 + $0x48] sm:$0xff] (!%p114_p2)  ;;  %v173_v19 = vld [vmem:[%s989_s1 + $0x50] sm:$0xff] (!%p114_p2)  ;;  %v174_v23 = vld [vmem:[%s989_s1 + $0x58] sm:$0xff] (!%p114_p2) }
   0x9   : > { %806 = vmatpush3.bf16.msra.mxu1 (!%p114_p2), %v766_v3  ;;  %v782_v22 = vpack.c.bf16 (!%p114_p2), %v173_v19, %v172_v18  ;;  %v175_v24 = vld [vmem:[%s989_s1 + $0x60] sm:$0xff] (!%p114_p2)  ;;  %v176_v28 = vld [vmem:[%s989_s1 + $0x68] sm:$0xff] (!%p114_p2)  ;;  %v177_v29 = vld [vmem:[%s989_s1 + $0x70] sm:$0xff] (!%p114_p2) }
   0xa   : > { %799 = vmatprep.subr.bf16.mxu1 (!%p114_p2), %v770_v6  ;;  %v786_v27 = vpack.c.bf16 (!%p114_p2), %v175_v24, %v174_v23  ;;  %v790_v32 = vpack.c.bf16 (!%p114_p2), %v177_v29, %v176_v28  ;;  %v178_v38 = vld [vmem:[%s989_s1 + $0x78] sm:$0xff] (!%p114_p2)  ;;  %v179_v39 = vld [vmem:[%s989_s1 + $0x80] sm:$0xff] (!%p114_p2) }
   0xb   : > { %v794_v40 = vpack.c.bf16 (!%p114_p2), %v179_v39, %v178_v38 }
   0xd   : > { %s992_s13 = smov (!%p136_p3, %s613_s13), 31  ;;  %807 = vmatpush3.bf16.msra.mxu1 %v770_v6 }
   0xe   : > { %s614_s26 = sshll.u32 %s992_s13, 3  ;;  %800 = vmatprep.subr.bf16.mxu1 %v774_v12 }
   0xf   : > { %s882_s29 = scalar_lea.vmem %s988_s0, %s614_s26  ;;  %s951_s27 = scalar_lea.vmem %s990_s2, %s614_s26 }
  0x10   : > { %v147_v9 = vld [vmem:[%s882_s29] sm:$0xff]  ;;  %v148_v10 = vld [vmem:[%s882_s29 + $0x8] sm:$0xff]  ;;  %v149_v11 = vld [vmem:[%s882_s29 + $0x10] sm:$0xff] }
  0x11   : > { %686 = vmatprep.mubr.msk.f32.mxu0 %vm180_vm0, %v147_v9  ;;  %v150_v15 = vld [vmem:[%s882_s29 + $0x18] sm:$0xff]  ;;  %v151_v16 = vld [vmem:[%s882_s29 + $0x20] sm:$0xff]  ;;  %808 = vmatpush3.bf16.msra.mxu1 %v774_v12  ;;  %v152_v20 = vld [vmem:[%s882_s29 + $0x28] sm:$0xff] }
  0x12   : > { %687 = vmatmul.mubr.msk.f32.vlgmr.msra.gmra.mrb[0].mxu0 %vm180_vm0, %v148_v10  ;;  %801 = vmatprep.subr.bf16.mxu1 %v778_v17  ;;  %v153_v21 = vld [vmem:[%s882_s29 + $0x30] sm:$0xff]  ;;  %v154_v25 = vld [vmem:[%s882_s29 + $0x38] sm:$0xff]  ;;  %v155_v26 = vld [vmem:[%s882_s29 + $0x40] sm:$0xff] }
  0x13   : > { %689 = vmatprep.mubr.msk.f32.mxu0 %vm180_vm0, %v149_v11  ;;  %769 = vmatpush3.bf16.msra.mxu0 %v766_v3  ;;  %v156_v30 = vld [vmem:[%s882_s29 + $0x48] sm:$0xff]  ;;  %v157_v31 = vld [vmem:[%s882_s29 + $0x50] sm:$0xff]  ;;  %v158_v33 = vld [vmem:[%s882_s29 + $0x58] sm:$0xff] }
  0x14   : > { %771 = vmatprep.subr.bf16.mxu0 %v770_v6  ;;  %v159_v34 = vld [vmem:[%s882_s29 + $0x60] sm:$0xff]  ;;  %v160_v35 = vld [vmem:[%s882_s29 + $0x68] sm:$0xff]  ;;  %v161_v36 = vld [vmem:[%s882_s29 + $0x70] sm:$0xff] }
  0x15   : > { %809 = vmatpush3.bf16.msra.mxu1 %v778_v17  ;;  %v162_v37 = vld [vmem:[%s882_s29 + $0x78] sm:$0xff] }
  0x16   : > { %690 = vmatmul.mubr.msk.f32.gmra.mrb[2].mxu0 %vm180_vm0, %v150_v15  ;;  %802 = vmatprep.subr.bf16.mxu1 %v782_v22 }
  0x17   : > { %692 = vmatprep.mubr.msk.f32.mxu0 %vm180_vm0, %v151_v16  ;;  %773 = vmatpush3.bf16.msra.mxu0 %v770_v6 }
  0x18   : > { %775 = vmatprep.subr.bf16.mxu0 %v774_v12 }
  0x19   : > { %810 = vmatpush3.bf16.msra.mxu1 %v782_v22 }
  0x1a   : > { %693 = vmatmul.mubr.msk.f32.gmra.mrb[4].mxu0 %vm180_vm0, %v152_v20  ;;  %803 = vmatprep.subr.bf16.mxu1 %v786_v27 }
  0x1b   : > { %695 = vmatprep.mubr.msk.f32.mxu0 %vm180_vm0, %v153_v21  ;;  %777 = vmatpush3.bf16.msra.mxu0 %v774_v12 }
  0x1c   : > { %779 = vmatprep.subr.bf16.mxu0 %v778_v17 }
  0x1d   : > { %811 = vmatpush3.bf16.msra.mxu1 %v786_v27 }
  0x1e   : > { %696 = vmatmul.mubr.msk.f32.gmra.mrb[6].mxu0 %vm180_vm0, %v154_v25  ;;  %804 = vmatprep.subr.bf16.mxu1 %v790_v32 }
  0x1f   : > { %698 = vmatprep.mubr.msk.f32.mxu0 %vm180_vm0, %v155_v26  ;;  %781 = vmatpush3.bf16.msra.mxu0 %v778_v17 }
  0x20   : > { %783 = vmatprep.subr.bf16.mxu0 %v782_v22 }
  0x21   : > { %812 = vmatpush3.bf16.msra.mxu1 %v790_v32 }
  0x22   : > { %699 = vmatmul.mubr.msk.f32.gmra.mrb[8].mxu0 %vm180_vm0, %v156_v30  ;;  %805 = vmatprep.subr.bf16.mxu1 %v794_v40 }
  0x23   : > { %701 = vmatprep.mubr.msk.f32.mxu0 %vm180_vm0, %v157_v31  ;;  %785 = vmatpush3.bf16.msra.mxu0 %v782_v22 }
  0x24   : > { %787 = vmatprep.subr.bf16.mxu0 %v786_v27 }
  0x25   : > { %813 = vmatpush3.bf16.msra.mxu1 %v794_v40 }
  0x26   : > { %702 = vmatmul.mubr.msk.f32.gmra.mrb[10].mxu0 %vm180_vm0, %v158_v33 }
  0x27   : > { %704 = vmatprep.mubr.msk.f32.mxu0 %vm180_vm0, %v159_v34  ;;  %789 = vmatpush3.bf16.msra.mxu0 %v786_v27 }
  0x28   : > { %791 = vmatprep.subr.bf16.mxu0 %v790_v32 }
  0x2a   : > { %705 = vmatmul.mubr.msk.f32.gmra.mrb[12].mxu0 %vm180_vm0, %v160_v35 }
  0x2b   : > { %707 = vmatprep.mubr.msk.f32.mxu0 %vm180_vm0, %v161_v36  ;;  %793 = vmatpush3.bf16.msra.mxu0 %v790_v32 }
  0x2c   : > { %795 = vmatprep.subr.bf16.mxu0 %v794_v40 }
  0x2e   : > { %708 = vmatmul.mubr.msk.f32.gmra.mrb[14].mxu0 %vm180_vm0, %v162_v37 }
  0x2f   : > { %797 = vmatpush3.bf16.msra.mxu0 %v794_v40 }
  0xe5   : > { %v688_v41 = vpop.f32.mrb[0].mxu0 }
  0xe6   : > { %v295_v42 = vpop.f32.mrb[1].mxu0  ;;  %v375_v44 = vmax.f32 %v688_v41, 0.0 }
  0xe7   : > { %v374_v43 = vmax.f32 %v295_v42, 0.0 }
  0xe9   : > { %v691_v45 = vpop.f32.mrb[2].mxu0  ;;  %742 = vmatprep.mubr.f32.mxu0 %v374_v43 }
  0xea   : > { %v305_v46 = vpop.f32.mrb[3].mxu0  ;;  %743 = vmatmul.mubr.f32.vlgmr.msra.gmra.mrb[16].mxu0 %v375_v44  ;;  %v377_v48 = vmax.f32 %v691_v45, 0.0 }
  0xeb   : > { %v376_v47 = vmax.f32 %v305_v46, 0.0 }
  0xed   : > { %v694_v49 = vpop.f32.mrb[4].mxu0  ;;  %745 = vmatprep.mubr.f32.mxu0 %v376_v47 }
  0xee   : > { %v315_v50 = vpop.f32.mrb[5].mxu0  ;;  %746 = vmatmul.mubr.f32.gmra.mrb[18].mxu0 %v377_v48  ;;  %v379_v52 = vmax.f32 %v694_v49, 0.0 }
  0xef   : > { %v378_v51 = vmax.f32 %v315_v50, 0.0 }
  0xf1   : > { %v697_v53 = vpop.f32.mrb[6].mxu0  ;;  %748 = vmatprep.mubr.f32.mxu0 %v378_v51 }
  0xf2   : > { %v325_v54 = vpop.f32.mrb[7].mxu0  ;;  %749 = vmatmul.mubr.f32.gmra.mrb[20].mxu0 %v379_v52  ;;  %v381_v56 = vmax.f32 %v697_v53, 0.0 }
  0xf3   : > { %v380_v55 = vmax.f32 %v325_v54, 0.0 }
  0xf5   : > { %v700_v57 = vpop.f32.mrb[8].mxu0  ;;  %751 = vmatprep.mubr.f32.mxu1 %v380_v55 }
  0xf6   : > { %v335_v58 = vpop.f32.mrb[9].mxu0  ;;  %752 = vmatmul.mubr.f32.vlgmr.msra.gmra.mrb[0].mxu1 %v381_v56  ;;  %v383_v60 = vmax.f32 %v700_v57, 0.0 }
  0xf7   : > { %v382_v59 = vmax.f32 %v335_v58, 0.0 }
  0xf9   : > { %v703_v61 = vpop.f32.mrb[10].mxu0  ;;  %754 = vmatprep.mubr.f32.mxu1 %v382_v59 }
  0xfa   : > { %v345_v62 = vpop.f32.mrb[11].mxu0  ;;  %755 = vmatmul.mubr.f32.gmra.mrb[2].mxu1 %v383_v60  ;;  %v385_v0 = vmax.f32 %v703_v61, 0.0 }
  0xfb   : > { %v384_v63 = vmax.f32 %v345_v62, 0.0 }
  0xfd   : > { %v706_v1 = vpop.f32.mrb[12].mxu0  ;;  %757 = vmatprep.mubr.f32.mxu1 %v384_v63 }
  0xfe   : > { %v355_v2 = vpop.f32.mrb[13].mxu0  ;;  %758 = vmatmul.mubr.f32.gmra.mrb[4].mxu1 %v385_v0  ;;  %v387_v4 = vmax.f32 %v706_v1, 0.0 }
  0xff   : > { %v386_v3 = vmax.f32 %v355_v2, 0.0 }
 0x101   : > { %v709_v5 = vpop.f32.mrb[14].mxu0  ;;  %760 = vmatprep.mubr.f32.mxu1 %v386_v3 }
 0x102   : > { %v365_v6 = vpop.f32.mrb[15].mxu0  ;;  %761 = vmatmul.mubr.f32.gmra.mrb[6].mxu1 %v387_v4  ;;  %v389_v8 = vmax.f32 %v709_v5, 0.0 }
 0x103   : > { %v388_v7 = vmax.f32 %v365_v6, 0.0 }
 0x105   : > { %763 = vmatprep.mubr.f32.mxu1 %v388_v7 }
 0x106   : > { %764 = vmatmul.mubr.f32.gmra.mrb[8].mxu1 %v389_v8 }
 0x1bd   : > { %v744_v9 = vpop.f32.mrb[16].mxu0 }
 0x1be   : > { %537 = vst.msk [vmem:[%s951_s27 + $0x8] sm:$0xff] %vm535_vm1, %v744_v9  ;;  %v456_v10 = vpop.f32.mrb[17].mxu0 }
 0x1bf   : > { %536 = vst.msk [vmem:[%s951_s27] sm:$0xff] %vm535_vm1, %v456_v10 }
 0x1c1   : > { %v747_v11 = vpop.f32.mrb[18].mxu0 }
 0x1c2   : > { %539 = vst.msk [vmem:[%s951_s27 + $0x18] sm:$0xff] %vm535_vm1, %v747_v11  ;;  %v466_v12 = vpop.f32.mrb[19].mxu0 }
 0x1c3   : > { %538 = vst.msk [vmem:[%s951_s27 + $0x10] sm:$0xff] %vm535_vm1, %v466_v12 }
 0x1c5   : > { %v750_v13 = vpop.f32.mrb[20].mxu0 }
 0x1c6   : > { %541 = vst.msk [vmem:[%s951_s27 + $0x28] sm:$0xff] %vm535_vm1, %v750_v13  ;;  %v476_v14 = vpop.f32.mrb[21].mxu0 }
 0x1c7   : > { %540 = vst.msk [vmem:[%s951_s27 + $0x20] sm:$0xff] %vm535_vm1, %v476_v14 }
 0x1c9   : > { %v753_v15 = vpop.f32.mrb[0].mxu1 }
 0x1ca   : > { %543 = vst.msk [vmem:[%s951_s27 + $0x38] sm:$0xff] %vm535_vm1, %v753_v15  ;;  %v486_v16 = vpop.f32.mrb[1].mxu1 }
 0x1cb   : > { %542 = vst.msk [vmem:[%s951_s27 + $0x30] sm:$0xff] %vm535_vm1, %v486_v16 }
 0x1cd   : > { %v756_v17 = vpop.f32.mrb[2].mxu1 }
 0x1ce   : > { %545 = vst.msk [vmem:[%s951_s27 + $0x48] sm:$0xff] %vm535_vm1, %v756_v17  ;;  %v496_v18 = vpop.f32.mrb[3].mxu1 }
 0x1cf   : > { %544 = vst.msk [vmem:[%s951_s27 + $0x40] sm:$0xff] %vm535_vm1, %v496_v18 }
 0x1d1   : > { %v759_v19 = vpop.f32.mrb[4].mxu1 }
 0x1d2   : > { %547 = vst.msk [vmem:[%s951_s27 + $0x58] sm:$0xff] %vm535_vm1, %v759_v19  ;;  %v506_v20 = vpop.f32.mrb[5].mxu1 }
 0x1d3   : > { %546 = vst.msk [vmem:[%s951_s27 + $0x50] sm:$0xff] %vm535_vm1, %v506_v20 }
 0x1d5   : > { %v762_v21 = vpop.f32.mrb[6].mxu1 }
 0x1d6   : > { %549 = vst.msk [vmem:[%s951_s27 + $0x68] sm:$0xff] %vm535_vm1, %v762_v21  ;;  %v516_v22 = vpop.f32.mrb[7].mxu1 }
 0x1d7   : > { %548 = vst.msk [vmem:[%s951_s27 + $0x60] sm:$0xff] %vm535_vm1, %v516_v22 }
 0x1d9   : > { %v765_v23 = vpop.f32.mrb[8].mxu1 }
 0x1da   : > { %551 = vst.msk [vmem:[%s951_s27 + $0x78] sm:$0xff] %vm535_vm1, %v765_v23  ;;  %v526_v24 = vpop.f32.mrb[9].mxu1 }
 0x1db   : > { %550 = vst.msk [vmem:[%s951_s27 + $0x70] sm:$0xff] %vm535_vm1, %v526_v24 }
 0x1dc PF: > { %s12_s9 = sadd.s32 1, %s828_s9  }
 0x1dd   : > { %p9_p4 = scmp.ge.s32.totalorder %s12_s9, 4  }
 0x1df   :  { %11 = sbr.rel (!%p9_p4) target bundleno = 1 (0x1), region = 58 }

</bundles_post_ra>
